<compile_context>
chip_gen: v7x
topology: tpu7x:2x2x1
jax: 0.10.0
libtpu: 0.0.40
codegen_flags: <defaults>
</compile_context>

<pallas_src>
import functools

import jax
import jax.numpy as jnp
from jax.experimental import pallas as pl
from jax.experimental.pallas import tpu as pltpu


def _round_up(x, m):
    return ((x + m - 1) // m) * m


def _relpos_kernel(q_ref, rel_ref, o_ref, emb_ref, *, tokens, bh_tile, base_shift):
    # q_ref:   (bh_tile*T, D)   current batch*head rows, token-major
    # rel_ref: (D, Wp)          transposed / zero-padded / pre-rolled rel_emb
    # o_ref:   (bh_tile, T, T)
    # emb_ref: (bh_tile*T, Wp)  f32 VMEM scratch for the matmul result
    emb_ref[...] = jnp.dot(q_ref[...], rel_ref[...],
                           preferred_element_type=jnp.float32)
    # rel -> abs: because rel was pre-rolled host-side by (T-1+base_shift),
    # out[i, j] = emb_s[i, (j - (base_shift + i)) mod Wp], i.e. a per-sublane
    # lane rotation with stride 1, then keep the first T lanes.
    for k in range(bh_tile):                               # static unroll
        blk = emb_ref[pl.ds(k * tokens, tokens), :]        # (T, Wp)
        rolled = pltpu.roll(blk, base_shift, 1, stride=1, stride_axis=0)
        o_ref[k] = rolled[:, :tokens].astype(o_ref.dtype)


def _est_vmem_bytes(bh_tile, tokens, dim_head, wp):
    m = bh_tile * tokens
    # double-buffered q & out blocks + emb scratch + rel block (2 buffers)
    return 4 * (2 * m * dim_head + 2 * bh_tile * tokens * tokens
                + m * wp + 2 * dim_head * wp)


def _choose_bh_tile(bh, tokens, dim_head, wp, vmem_budget=32 << 20):
    """Largest divisor of bh with M = tile*T around 512 rows that fits VMEM."""
    candidates = [x for x in range(1, bh + 1)
                  if bh % x == 0 and ((x * tokens) % 8 == 0 or x == bh)]
    good = [x for x in candidates
            if x * tokens <= 512
            and _est_vmem_bytes(x, tokens, dim_head, wp) <= vmem_budget]
    if not good:
        return min(candidates)
    if bh >= 2:
        # keep >= 2 grid steps so the "parallel" axis can shard across cores
        good = [x for x in good if bh // x >= 2] or good
    return max(good)


def rel_pos_emb_1d_pallas(q, rel_emb, *, compute_dtype=None):
    """q: [B, H, T, D]; rel_emb: [2T-1, D] shared across heads -> [B, H, T, T]."""
    b, h, t, d = q.shape
    r_len = 2 * t - 1
    assert rel_emb.shape == (r_len, d)
    bh = b * h

    wp = _round_up(max(2 * t, 128), 128)      # lane-dense padded rel width
    base_shift = 1                            # keep all in-kernel roll shifts > 0

    # Host-side layout plumbing (done once): transpose, zero-pad to Wp lanes,
    # pre-roll by (T-1+base_shift) so the kernel's per-row shift is base+i.
    rel_t = jnp.pad(rel_emb.T, ((0, 0), (0, wp - r_len)))     # (D, Wp)
    rel_t = jnp.roll(rel_t, -(t - 1 + base_shift), axis=1)

    q2 = q.reshape(bh * t, d)
    if compute_dtype is not None:             # e.g. jnp.bfloat16 for v5e/v6e/v7x MXU
        q2 = q2.astype(compute_dtype)
        rel_t = rel_t.astype(compute_dtype)

    bh_tile = _choose_bh_tile(bh, t, d, wp)
    grid = (bh // bh_tile,)

    est = _est_vmem_bytes(bh_tile, t, d, wp)
    vmem_limit = min(est + (8 << 20), 96 << 20) if est > (24 << 20) else None

    out = pl.pallas_call(
        functools.partial(_relpos_kernel, tokens=t, bh_tile=bh_tile,
                          base_shift=base_shift),
        out_shape=jax.ShapeDtypeStruct((bh, t, t), q.dtype),
        grid_spec=pltpu.PrefetchScalarGridSpec(
            num_scalar_prefetch=0,
            grid=grid,
            in_specs=[
                pl.BlockSpec((bh_tile * t, d), lambda i: (i, 0)),
                pl.BlockSpec((d, wp), lambda i: (0, 0)),
            ],
            out_specs=pl.BlockSpec((bh_tile, t, t), lambda i: (i, 0, 0)),
            scratch_shapes=[pltpu.VMEM((bh_tile * t, wp), jnp.float32)],
        ),
        compiler_params=pltpu.CompilerParams(
            dimension_semantics=("parallel",),
            vmem_limit_bytes=vmem_limit,
        ),
    )(q2, rel_t)

    return out.reshape(b, h, t, t)


class RelPosEmb1DAISummer:
    """Shared-heads relative positional embedding (heads=None path of the
    PyTorch module)."""
    # TODO(synk): the per-head (3D rel_emb) branch of the reference module is
    # unreachable as written (shared_heads is truthy whenever heads is given),
    # so only the shared-heads semantics are implemented.

    def __init__(self, tokens, dim_head, key):
        scale = dim_head ** (-0.5)
        self.tokens = tokens
        self.dim_head = dim_head
        self.rel_pos_emb = (
            jax.random.normal(key, (2 * tokens - 1, dim_head), dtype=jnp.float32)
            * scale
        )

    def __call__(self, q):
        return rel_pos_emb_1d_pallas(q, self.rel_pos_emb)


def _reference(q, rel_emb):
    """Pure-JAX reference of einsum + rel_to_abs for verification."""
    b, h, t, d = q.shape
    emb = jnp.einsum("bhtd,rd->bhtr", q, rel_emb)           # (b, h, t, 2t-1)
    i = jnp.arange(t)[:, None]
    j = jnp.arange(t)[None, :]
    idx = (j - i + t - 1)                                   # (t, t)
    idx_b = jnp.broadcast_to(idx, (b, h, t, t))
    return jnp.take_along_axis(emb, idx_b, axis=-1)


if __name__ == "__main__":
    batch, heads, tokens, dim_head = 2, 4, 8, 32

    key = jax.random.PRNGKey(0)
    k_q, k_emb = jax.random.split(key)

    q = jax.random.normal(k_q, (batch, heads, tokens, dim_head), dtype=jnp.float32)

    module = RelPosEmb1DAISummer(tokens, dim_head, k_emb)

    out = module(q)
    out = jax.block_until_ready(out)

    ref = _reference(q, module.rel_pos_emb)
    assert out.shape == (batch, heads, tokens, tokens)
    assert jnp.allclose(out, ref, atol=1e-4, rtol=1e-4), float(
        jnp.max(jnp.abs(out - ref)))

    print("KERNEL_OK")
</pallas_src>

<mosaic_0001>
module attributes {stable_mosaic.version = 11 : i64} {
  func.func @_relpos_kernel(%arg0: i32, %arg1: memref<32x32xf32, #tpu.memory_space<vmem>>, %arg2: memref<32x128xf32, #tpu.memory_space<vmem>>, %arg3: memref<4x8x8xf32, #tpu.memory_space<vmem>>, %arg4: memref<32x128xf32, #tpu.memory_space<vmem>>) attributes {dimension_semantics = [#tpu.dimension_semantics<parallel>], iteration_bounds = array<i64: 2>, scalar_prefetch = 0 : i64, scratch_operands = 1 : i64, tpu.core_type = #tpu.core_type<tc>, window_params = [{transform_indices = @transform_0, window_bounds = array<i64: 32, 32>}, {pipeline_mode = #tpu.pipeline_mode<synchronous>, transform_indices = @transform_1, window_bounds = array<i64: 32, 128>}, {transform_indices = @transform_2, window_bounds = array<i64: 4, 8, 8>}]} {
    %c0 = arith.constant 0 : index
    %c0_0 = arith.constant 0 : index
    %0 = vector.load %arg1[%c0, %c0_0] : memref<32x32xf32, #tpu.memory_space<vmem>>, vector<32x32xf32>
    %c0_1 = arith.constant 0 : index
    %c0_2 = arith.constant 0 : index
    %1 = vector.load %arg2[%c0_1, %c0_2] : memref<32x128xf32, #tpu.memory_space<vmem>>, vector<32x128xf32>
    %cst = arith.constant dense<0.000000e+00> : vector<32x128xf32>
    %2 = tpu.matmul %0, %1, %cst {dimension_numbers = #tpu.dot_dimension_numbers<[1], [0], [0], [1], [0, 0, 1, 1], [], []>} : vector<32x32xf32>, vector<32x128xf32>, vector<32x128xf32> -> vector<32x128xf32>
    %c0_3 = arith.constant 0 : index
    %c0_4 = arith.constant 0 : index
    %3 = vector.load %arg4[%c0_3, %c0_4] : memref<32x128xf32, #tpu.memory_space<vmem>>, vector<32x128xf32>
    tpu.vector_store %arg4[%c0_3, %c0_4], %2 {strides = array<i32>} : memref<32x128xf32, #tpu.memory_space<vmem>>, vector<32x128xf32>,
    %c0_5 = arith.constant 0 : index
    %c0_6 = arith.constant 0 : index
    %4 = vector.load %arg4[%c0_5, %c0_6] : memref<32x128xf32, #tpu.memory_space<vmem>>, vector<8x128xf32>
    %c1_i32 = arith.constant 1 : i32
    %5 = tpu.dynamic_rotate %4 by %c1_i32 dim 1 {stride = 1 : si32, stride_dimension = 0 : si32} : vector<8x128xf32>, i32 -> vector<8x128xf32>
    %6 = vector.extract_strided_slice %5 {offsets = [0, 0], sizes = [8, 8], strides = [1, 1]} : vector<8x128xf32> to vector<8x8xf32>
    %c0_7 = arith.constant 0 : index
    %c0_8 = arith.constant 0 : index
    %c0_9 = arith.constant 0 : index
    %7 = vector.load %arg3[%c0_7, %c0_8, %c0_9] : memref<4x8x8xf32, #tpu.memory_space<vmem>>, vector<1x8x8xf32>
    %8 = vector.shape_cast %7 : vector<1x8x8xf32> to vector<8x8xf32>
    %9 = vector.shape_cast %6 : vector<8x8xf32> to vector<1x8x8xf32>
    tpu.vector_store %arg3[%c0_7, %c0_8, %c0_9], %9 {strides = array<i32>} : memref<4x8x8xf32, #tpu.memory_space<vmem>>, vector<1x8x8xf32>,
    %c8 = arith.constant 8 : index
    %c0_10 = arith.constant 0 : index
    %10 = vector.load %arg4[%c8, %c0_10] : memref<32x128xf32, #tpu.memory_space<vmem>>, vector<8x128xf32>
    %c1_i32_11 = arith.constant 1 : i32
    %11 = tpu.dynamic_rotate %10 by %c1_i32_11 dim 1 {stride = 1 : si32, stride_dimension = 0 : si32} : vector<8x128xf32>, i32 -> vector<8x128xf32>
    %12 = vector.extract_strided_slice %11 {offsets = [0, 0], sizes = [8, 8], strides = [1, 1]} : vector<8x128xf32> to vector<8x8xf32>
    %c1 = arith.constant 1 : index
    %c0_12 = arith.constant 0 : index
    %c0_13 = arith.constant 0 : index
    %13 = vector.load %arg3[%c1, %c0_12, %c0_13] : memref<4x8x8xf32, #tpu.memory_space<vmem>>, vector<1x8x8xf32>
    %14 = vector.shape_cast %13 : vector<1x8x8xf32> to vector<8x8xf32>
    %15 = vector.shape_cast %12 : vector<8x8xf32> to vector<1x8x8xf32>
    tpu.vector_store %arg3[%c1, %c0_12, %c0_13], %15 {strides = array<i32>} : memref<4x8x8xf32, #tpu.memory_space<vmem>>, vector<1x8x8xf32>,
    %c16 = arith.constant 16 : index
    %c0_14 = arith.constant 0 : index
    %16 = vector.load %arg4[%c16, %c0_14] : memref<32x128xf32, #tpu.memory_space<vmem>>, vector<8x128xf32>
    %c1_i32_15 = arith.constant 1 : i32
    %17 = tpu.dynamic_rotate %16 by %c1_i32_15 dim 1 {stride = 1 : si32, stride_dimension = 0 : si32} : vector<8x128xf32>, i32 -> vector<8x128xf32>
    %18 = vector.extract_strided_slice %17 {offsets = [0, 0], sizes = [8, 8], strides = [1, 1]} : vector<8x128xf32> to vector<8x8xf32>
    %c2 = arith.constant 2 : index
    %c0_16 = arith.constant 0 : index
    %c0_17 = arith.constant 0 : index
    %19 = vector.load %arg3[%c2, %c0_16, %c0_17] : memref<4x8x8xf32, #tpu.memory_space<vmem>>, vector<1x8x8xf32>
    %20 = vector.shape_cast %19 : vector<1x8x8xf32> to vector<8x8xf32>
    %21 = vector.shape_cast %18 : vector<8x8xf32> to vector<1x8x8xf32>
    tpu.vector_store %arg3[%c2, %c0_16, %c0_17], %21 {strides = array<i32>} : memref<4x8x8xf32, #tpu.memory_space<vmem>>, vector<1x8x8xf32>,
    %c24 = arith.constant 24 : index
    %c0_18 = arith.constant 0 : index
    %22 = vector.load %arg4[%c24, %c0_18] : memref<32x128xf32, #tpu.memory_space<vmem>>, vector<8x128xf32>
    %c1_i32_19 = arith.constant 1 : i32
    %23 = tpu.dynamic_rotate %22 by %c1_i32_19 dim 1 {stride = 1 : si32, stride_dimension = 0 : si32} : vector<8x128xf32>, i32 -> vector<8x128xf32>
    %24 = vector.extract_strided_slice %23 {offsets = [0, 0], sizes = [8, 8], strides = [1, 1]} : vector<8x128xf32> to vector<8x8xf32>
    %c3 = arith.constant 3 : index
    %c0_20 = arith.constant 0 : index
    %c0_21 = arith.constant 0 : index
    %25 = vector.load %arg3[%c3, %c0_20, %c0_21] : memref<4x8x8xf32, #tpu.memory_space<vmem>>, vector<1x8x8xf32>
    %26 = vector.shape_cast %25 : vector<1x8x8xf32> to vector<8x8xf32>
    %27 = vector.shape_cast %24 : vector<8x8xf32> to vector<1x8x8xf32>
    tpu.vector_store %arg3[%c3, %c0_20, %c0_21], %27 {strides = array<i32>} : memref<4x8x8xf32, #tpu.memory_space<vmem>>, vector<1x8x8xf32>,
    return
  }
  func.func @transform_0(%arg0: i32) -> (i32, i32) {
    %c0_i32 = arith.constant 0 : i32
    %c0_i32_0 = arith.constant 0 : i32
    return %arg0, %c0_i32 : i32, i32
  }
  func.func @transform_1(%arg0: i32) -> (i32, i32) {
    %c0_i32 = arith.constant 0 : i32
    %c0_i32_0 = arith.constant 0 : i32
    %c0_i32_1 = arith.constant 0 : i32
    return %c0_i32, %c0_i32_0 : i32, i32
  }
  func.func @transform_2(%arg0: i32) -> (i32, i32, i32) {
    %c0_i32 = arith.constant 0 : i32
    %c0_i32_0 = arith.constant 0 : i32
    %c0_i32_1 = arith.constant 0 : i32
    return %arg0, %c0_i32, %c0_i32_0 : i32, i32, i32
  }
}

</mosaic_0001>

<bundles_post_ra>
// kernel: tpu_custom_call.1
= control target key start
LH: loop header
LB: loop body
LE: loop exit
PB: predicated region body
PF: predicated region fallthrough
CT: control target
= control target key end

     0   :  { %7 = vsyncpa [#allocation4], 0  ;;  %s652_s0 = inlined_call_operand.vmem [shape: f32[64,32], index: 0, kind: input, shape index: {}]   ;;  %s653_s1 = inlined_call_operand.vmem [shape: f32[32,128], index: 1, kind: input, shape index: {}]   ;;  %s654_s2 = inlined_call_operand.hbm [shape: f32[8,8,8], index: 2, kind: output, shape index: {}]  }
   0x1   :  { %9 = vsyncpa [#allocation4 + $0x1], 0  ;;  %s538_s9 = smov 0   ;;  %s540_s10 = smov 0  }
   0x2   :  { %s542_s11 = smov 0   ;;  %s544_s12 = smov 0  }
   0x3 LB: > { %s559_s13 = sadd.s32 4294967295, %s517_s12   ;;  %s359_s14 = sadd.s32 4294967294, %s517_s12   ;;  %s517_s12 = sphi %s544_s12, %s660_s12   ;;  %s513_s11 = sphi %s542_s11, %s659_s11   ;;  %s509_s10 = sphi %s540_s10, %s658_s10   ;;  %s505_s9 = sphi %s538_s9, %s657_s9  }
   0x4   : > { %s563_s15 = sadd.s32 1, %s517_s12   ;;  %s69_s16 = sadd.s32 1, %s513_s11 }
   0x5   : > { %s66_s17 = ssub.s32 %s517_s12, %s563_s15  ;;  %p79_p0 = scmp.ne.s32.totalorder %s513_s11, %s509_s10 }
   0x6   : > { %p67_p1 = scmp.eq.s32.totalorder %s66_s17, 0  ;;  %p80_p2 = scmp.eq.s32.totalorder %s559_s13, 1 }
   0x7   : > { %p85_p3 = scmp.ne.s32.totalorder %s509_s10, %s505_s9  ;;  %p86_p4 = scmp.eq.s32.totalorder %s359_s14, 1 }
   0x8   : > { %s574_s18 = scalar_select %p67_p1, %s513_s11, %s69_s16  }
   0x9   : > { %p576_p5 = por %p80_p2, %p79_p0  ;;  %p580_p6 = por %p86_p4, %p85_p3 }
   0xa   : > { %p362_p7 = scmp.ge.s32.totalorder %s517_s12, 1  ;;  %p116_p8 = scmp.lt.s32.totalorder %s517_s12, 3 }
   0xc   : > { %p117_p9 = pnand %p362_p7, %p116_p8 }
   0xd   : > { %v149_v0 = vld [vmem:[%s653_s1] sm:$0xff] (!%p117_p9)  ;;  %v150_v1 = vld [vmem:[%s653_s1 + $0x8] sm:$0xff] (!%p117_p9)  ;;  %v151_v2 = vld [vmem:[%s653_s1 + $0x10] sm:$0xff] (!%p117_p9)  ;;  %s364_s27 = sshll.u32 (!%p117_p9), %s559_s13, 2  ;;  %vm153_vm0 = vcmask (!%p117_p9), 261120   ;;  %s519_s6 = smov (!%p117_p9), 257  }
   0xe   : > { %120 = sbr.rel (%p117_p9) target bundleno = 373 (0x175), region = 28  ;;  %v401_v3 = vpack.c.bf16 (!%p117_p9), %v150_v1, %v149_v0  ;;  %v152_v4 = vld [vmem:[%s653_s1 + $0x18] sm:$0xff] (!%p117_p9)  ;;  %p139_p10 = scmp.lt.s32.totalorder (!%p117_p9), %s364_s27, 7  ;;  %vm260_vm1 = vcmask (!%p117_p9), 64512  }
   0xf   : > { %v405_v5 = vpack.c.bf16 (!%p117_p9), %v152_v4, %v151_v2  ;;  %s135_s7 = sand.u32 (!%p117_p9), 1, %s509_s10   ;;  %s378_s17 = sshll.u32 (!%p117_p9), %s559_s13, 9 }
  0x10   : > { %402 = vmatprep.subr.bf16.mxu0 (!%p117_p9), %v401_v3  ;;  %409 = vmatprep.subr.bf16.mxu1 (!%p117_p9), %v401_v3  ;;  %s363_s8 = sshll.u32 (!%p117_p9), %s135_s7, 5  ;;  %s609_s23 = scalar_lea.hbm (!%p117_p9), %s654_s2, %s378_s17 }
  0x11   : > { %404 = vmatpush3.bf16.msra.mxu0 (!%p117_p9), %v401_v3  ;;  %411 = vmatpush3.bf16.msra.mxu1 (!%p117_p9), %v401_v3  ;;  %s137_s14 = scalar_lea.vmem (!%p117_p9), [#allocation3], %s363_s8  ;;  %s611_s24 = scalar_lea.sflag (!%p117_p9), [#allocation4], %s135_s7 }
  0x12   : > { %406 = vmatprep.subr.bf16.mxu0 (!%p117_p9), %v405_v5  ;;  %410 = vmatprep.subr.bf16.mxu1 (!%p117_p9), %v405_v5  ;;  %s297_s16 = sshll.u32 (!%p117_p9), %s137_s14, 4  ;;  %s520_s25 = smov (!%p117_p9), [#allocation3]   ;;  %s604_s16 = int_to_ptr.vmem [resolvable:$true] %s297_s16 }
  0x13   : > { %s455_s13 = scalar_lea.vmem (!%p117_p9), %s604_s16, 512  ;;  %s459_s26 = sshll.u32 (!%p117_p9), %s520_s25, 4  ;;  %s460_s26 = int_to_ptr.vmem [resolvable:$false] %s459_s26 }
  0x14   : > { %p456_p11 = scmp.ne.s32.totalorder (!%p117_p9), %s604_s16, %s455_s13  ;;  %p462_p0 = scmp.lt.s32.totalorder (!%p117_p9), %s604_s16, %s460_s26 }
  0x15   : > { %s662_s27 = smov (!%p139_p10, %s364_s27), 7  ;;  %408 = vmatpush3.bf16.msra.mxu0 %v405_v5  ;;  %412 = vmatpush3.bf16.msra.mxu1 %v405_v5 }
  0x16   : > { %s365_s30 = sshll.u32 %s662_s27, 3  ;;  %p457_p12 = pnand %p456_p11, %p576_p5 }
  0x17   : > { %s142_s5 = scalar_lea.vmem %s652_s0, %s365_s30  ;;  %s461_s27 = scalar_lea.vmem %s460_s26, 1024 }
  0x18   : > { %v145_v6 = vld [vmem:[%s142_s5] sm:$0xff]  ;;  %v147_v7 = vld [vmem:[%s142_s5 + $0x10] sm:$0xff]  ;;  %v146_v8 = vld [vmem:[%s142_s5 + $0x8] sm:$0xff]  ;;  %p458_p13 = pneg %p457_p12  ;;  %p463_p1 = scmp.lt.s32.totalorder %s461_s27, %s455_s13 }
  0x19   : > { %v148_v9 = vld [vmem:[%s142_s5 + $0x18] sm:$0xff]  ;;  %395 = vmatprep.mubr.msk.f32.mxu0 %vm153_vm0, %v145_v6  ;;  %398 = vmatprep.mubr.msk.f32.mxu1 %vm153_vm0, %v147_v7 }
  0x1a   : > { %396 = vmatmul.mubr.msk.f32.vlgmr.msra.gmra.mrb[0].mxu0 %vm153_vm0, %v146_v8  ;;  %399 = vmatmul.mubr.msk.f32.vlgmr.msra.gmra.mrb[0].mxu1 %vm153_vm0, %v148_v9  ;;  %p464_p2 = por %p463_p1, %p462_p0 }
  0x1c   : > { %p465_p3 = pnand %p464_p2, %p458_p13 }
  0xed   : > { %v397_v10 = vpop.f32.mrb[0].mxu0  ;;  %v400_v11 = vpop.f32.mrb[0].mxu1 }
  0xee   : > { %v232_v12 = vpop.f32.mrb[1].mxu0  ;;  %v242_v13 = vpop.f32.mrb[1].mxu1 }
  0xef   : > { %272 = vrot.lane.b32.xlu1 %v242_v13, %s519_s6  ;;  %258 = vrot.lane.b32.xlu0 %v232_v12, %s519_s6 }
  0xf3   : > { %279 = vrot.lane.b32.xlu1 %v400_v11, %s519_s6  ;;  %265 = vrot.lane.b32.xlu0 %v397_v10, %s519_s6 }
 0x161   : > { %v273_v14 = vpop.permute.xlu1 %272  ;;  %v259_v15 = vpop.permute.xlu0 %258 }
 0x162   : > { %371 = vst.msk [vmem:[%s137_s14 + $0x10] sm:$0xff] %vm260_vm1, %v273_v14  ;;  %261 = vst.msk [vmem:[%s137_s14] sm:$0xff] %vm260_vm1, %v259_v15 }
 0x165   : > { %v280_v16 = vpop.permute.xlu1 %279  ;;  %v266_v17 = vpop.permute.xlu0 %265 }
 0x166   : > { %372 = vst.msk [vmem:[%s137_s14 + $0x18] sm:$0xff] %vm260_vm1, %v280_v16  ;;  %370 = vst.msk [vmem:[%s137_s14 + $0x8] sm:$0xff] %vm260_vm1, %v266_v17 }
 0x167   : > { %468 = shalt.err (!%p465_p3)
}
 0x168   : > { %s469_s28 = scalar_lea.hbm %s609_s23, 512  ;;  %s473_s3 = scalar_lea.hbm %s654_s2, 1024 }
 0x169   : > { %p470_p4 = scmp.ne.s32.totalorder %s609_s23, %s469_s28  ;;  %p474_p9 = scmp.lt.u32.totalorder %s609_s23, %s654_s2 }
 0x16a   : > { %p475_p10 = scmp.lt.u32.totalorder %s473_s3, %s469_s28  ;;  %p477_p12 = scmp.lt.u32.totalorder %s469_s28, %s609_s23 }
 0x16b   : > { %p471_p7 = pnand %p470_p4, %p576_p5 }
 0x16c   : > { %p476_p11 = por %p475_p10, %p474_p9 }
 0x16d   : > { %p472_p8 = pneg %p471_p7 }
 0x16e   : > { %p478_p13 = por %p477_p12, %p476_p11 }
 0x170   : > { %p479_p0 = pnand %p478_p13, %p472_p8 }
 0x172   : > { %482 = shalt.err (!%p479_p0)
}
 0x173   : > { %s521_s6 = smov 128   ;;  %s522_s7 = smov 8  }
 0x174   : > { %413 = dma.vmem_to_hbm [thread:$0]  (%p576_p5), %s604_s16, 512, %s609_s23, %s611_s24, %s521_s6, %s521_s6, %s522_s7  }
 0x175 PF: > { %p419_p1 = scmp.ge.s32.totalorder %s517_s12, 2  ;;  %s312_s8 = sand.u32 1, %s505_s9  }
 0x176   : > { %s313_s14 = scalar_lea.sflag [#allocation4], %s312_s8 }
 0x177   : > { %p416_p2 = pnand %p419_p1, %p580_p6 }
 0x179   : > { %500 = dma.done.wait (!%p416_p2), %s313_s14, 512  }
 0x17a   : > { %502 = vsyncadd (!%p416_p2), %s313_s14, 4294966784  ;;  %p12_p3 = scmp.ge.s32.totalorder %s563_s15, 4   ;;  %s657_s9 = smov %s509_s10 }
 0x17b   : > { %s658_s10 = smov %s513_s11  ;;  %s659_s11 = smov %s574_s18 }
 0x17c   : > { %s660_s12 = smov %s563_s15  ;;  %14 = sbr.rel (!%p12_p3) target bundleno = 3 (0x3), region = 66 }
 0x183   :  { %318 = vsyncpa [#allocation4], 1 }
 0x184   :  { %320 = vsyncpa [#allocation4 + $0x1], 1 }

</bundles_post_ra>
